<compile_context>
chip_gen: v7x
topology: tpu7x:2x2x1
jax: 0.10.0
libtpu: 0.0.40
codegen_flags: <defaults>
</compile_context>

<pallas_src>
import jax
import jax.numpy as jnp
from jax.experimental import pallas as pl
from jax.experimental.pallas import tpu as pltpu

EPS = 1e-5


def _make_conv_bn_kernel(*, C_in, C_out, Lt, Wp, NB, count, apply_bn_in,
                         per_tap_matmul):
    """3x3 conv (+ optional folded BN+ReLU on its input) + batch-stat accumulation."""
    halo = Wp + 1                                       # max |tap shift|
    taps = tuple(dy * Wp + dx for dy in (-1, 0, 1) for dx in (-1, 0, 1))
    f32, bf16 = jnp.float32, jnp.bfloat16

    def kernel(*refs):
        if apply_bn_in:
            (x_ref, w_ref, g_ref, b_ref, sc_in_ref, sf_in_ref, m_ref,
             y_ref, sc_out_ref, sf_out_ref, sum_ref, ssq_ref) = refs
        else:
            (x_ref, w_ref, g_ref, b_ref, m_ref,
             y_ref, sc_out_ref, sf_out_ref, sum_ref, ssq_ref) = refs

        step = pl.program_id(0)
        nsteps = pl.num_programs(0)

        @pl.when(step == 0)
        def _init():
            sum_ref[...] = jnp.zeros_like(sum_ref)
            ssq_ref[...] = jnp.zeros_like(ssq_ref)

        valid = m_ref[...] > 0.5                        # (1, Lt)
        zhalo = jnp.zeros((C_in, halo), bf16)
        s_loc = jnp.zeros((C_out, 1), f32)
        q_loc = jnp.zeros((C_out, 1), f32)

        for ib in range(NB):                            # static unroll over images
            a = x_ref[ib]                               # (C_in, Lt) bf16
            if apply_bn_in:
                # Folded BN (scale/shift from the previous pass) + ReLU in f32
                # (v5e VPU has no bf16 path), then re-zero the padding ring /
                # lane tail so it doubles as this conv's zero padding.
                af = jnp.maximum(a.astype(f32) * sc_in_ref[...] + sf_in_ref[...],
                                 0.0)
                a = jnp.where(valid, af, 0.0).astype(bf16)

            # In-VMEM halo so every tap is a plain static lane slice; halo
            # values only ever reach masked (ring/tail) output lanes, so zeros
            # are fine and HBM never carries margins.
            a_ext = jnp.concatenate([zhalo, a, zhalo], axis=1)  # (C_in, Lt+2*halo)

            if per_tap_matmul:
                # Large C_in: 9 accumulating matmuls (K = C_in each) so the
                # (9*C_in, Lt) patch matrix never exists in VMEM (v7x 64 MiB).
                acc = jnp.zeros((C_out, Lt), f32)
                for t, s in enumerate(taps):
                    acc = acc + jnp.dot(
                        w_ref[:, t * C_in:(t + 1) * C_in],
                        a_ext[:, halo + s: halo + s + Lt],
                        preferred_element_type=f32)
            else:
                # Small C_in: stack the 9 bf16 taps and do one MXU matmul.
                patches = jnp.concatenate(
                    [a_ext[:, halo + s: halo + s + Lt] for s in taps], axis=0)
                acc = jnp.dot(w_ref[...], patches, preferred_element_type=f32)

            # Zero ring/tail outputs (they double as the next conv's zero
            # padding), then store the full slab: lane-aligned, unmasked vst.
            acc = jnp.where(valid, acc, 0.0)
            y_ref[ib] = acc.astype(y_ref.dtype)

            # One-pass BN statistics on the f32 accumulator (valid lanes only).
            s_loc = s_loc + jnp.sum(acc, axis=1, keepdims=True)
            q_loc = q_loc + jnp.sum(acc * acc, axis=1, keepdims=True)

        sum_ref[...] += s_loc
        ssq_ref[...] += q_loc

        @pl.when(step == nsteps - 1)
        def _finalize():
            inv = 1.0 / count
            mean = sum_ref[...] * inv
            var = jnp.maximum(ssq_ref[...] * inv - mean * mean, 0.0)
            rstd = jax.lax.rsqrt(var + EPS)
            scale = g_ref[...] * rstd
            sc_out_ref[...] = scale
            sf_out_ref[...] = b_ref[...] - mean * scale

    return kernel


def _bn_relu_kernel(x_ref, sc_ref, sf_ref, o_ref):
    # Lane-dense folded BN + ReLU (bf16 in, f32 out).
    o_ref[0] = jnp.maximum(
        x_ref[0].astype(jnp.float32) * sc_ref[...] + sf_ref[...], 0.0)


def double_conv(x_nchw, w1, g1, b1, w2, g2, b2):
    """Forward of DoubleConv with training-mode BatchNorm (batch statistics).

    x_nchw: (N, Cin, H, W); w1: (Cout, Cin, 3, 3); w2: (Cout, Cout, 3, 3);
    g*/b*: (Cout,) BatchNorm affine parameters.
    """
    f32, bf16 = jnp.float32, jnp.bfloat16
    N, Cin, H, W = x_nchw.shape
    Cout = w1.shape[0]
    Hp, Wp = H + 2, W + 2
    L = Hp * Wp                       # zero-padded spatial positions per image
    Lt = -(-L // 128) * 128           # lane extent = full vregs (unmasked stores)
    Cpi = -(-Cin // 8) * 8            # pad conv1 input channels to a sublane tile
    # TODO(synk): for bf16 patch packing, rounding C_in to 16 avoids sub-tile
    # repack in the tap concat; skipped to keep inter-pass channel count tight.

    # Images per sequential grid step (amortizes ~0.35us/step when the
    # per-image matmul is tiny); must divide N.
    target = max(1, -(-1024 // Lt))
    NB = 1
    for d in range(1, N + 1):
        if N % d == 0 and d <= target:
            NB = d

    # ---- wrapper-side layout glue (no compute) ------------------------------
    x = jnp.pad(x_nchw.astype(f32), ((0, 0), (0, Cpi - Cin), (1, 1), (1, 1)))
    x = x.reshape(N, Cpi, L)
    x = jnp.pad(x, ((0, 0), (0, 0), (0, Lt - L))).astype(bf16)   # (N, Cpi, Lt)

    # Weights as (C_out, 9*C_in), tap-major to match the in-kernel tap stack.
    w1m = jnp.pad(w1.astype(f32), ((0, 0), (0, Cpi - Cin), (0, 0), (0, 0)))
    w1m = jnp.transpose(w1m, (0, 2, 3, 1)).reshape(Cout, 9 * Cpi).astype(bf16)
    w2m = jnp.transpose(w2.astype(f32), (0, 2, 3, 1)).reshape(Cout, 9 * Cout)
    w2m = w2m.astype(bf16)

    g1c = g1.reshape(Cout, 1).astype(f32)
    b1c = b1.reshape(Cout, 1).astype(f32)
    g2c = g2.reshape(Cout, 1).astype(f32)
    b2c = b2.reshape(Cout, 1).astype(f32)

    maskhw = jnp.zeros((Hp, Wp), f32).at[1:H + 1, 1:W + 1].set(1.0)
    mask = jnp.pad(maskhw.reshape(1, L), ((0, 0), (0, Lt - L)))  # (1, Lt)

    count = float(N * H * W)

    img_spec = lambda nb, C: pl.BlockSpec((nb, C, Lt), lambda g: (g, 0, 0))
    rep_spec = lambda r, c: pl.BlockSpec((r, c), lambda g: (0, 0))
    stats_shapes = (jax.ShapeDtypeStruct((Cout, 1), f32),
                    jax.ShapeDtypeStruct((Cout, 1), f32))
    stats_specs = (rep_spec(Cout, 1), rep_spec(Cout, 1))
    scratch = [pltpu.VMEM((Cout, 1), f32), pltpu.VMEM((Cout, 1), f32)]

    # BN statistics accumulate across the batch grid -> that axis must stay
    # sequential.  The final BN2+ReLU pass is embarrassingly parallel.
    # TODO(synk): v7x megacore -- split the batch grid across the 2 TCs with
    # per-core partial sum/ssq reduced in a tiny extra pass.
    # TODO(synk): for very large H*W, band the lane axis (halo via index_map)
    # so blocks stay under v7x's 64 MiB VMEM.
    seq_params = pltpu.CompilerParams(
        dimension_semantics=("arbitrary",),
        vmem_limit_bytes=64 * 1024 * 1024)
    par_params = pltpu.CompilerParams(
        dimension_semantics=("parallel",),
        vmem_limit_bytes=64 * 1024 * 1024)

    grid_conv = (N // NB,)

    # ---- pass 1: conv1 + BN1 batch statistics -------------------------------
    y1, sc1, sf1 = pl.pallas_call(
        _make_conv_bn_kernel(C_in=Cpi, C_out=Cout, Lt=Lt, Wp=Wp, NB=NB,
                             count=count, apply_bn_in=False,
                             per_tap_matmul=(Cpi >= 128)),
        grid=grid_conv,
        in_specs=[img_spec(NB, Cpi), rep_spec(Cout, 9 * Cpi),
                  rep_spec(Cout, 1), rep_spec(Cout, 1), rep_spec(1, Lt)],
        out_specs=(img_spec(NB, Cout),) + stats_specs,
        out_shape=(jax.ShapeDtypeStruct((N, Cout, Lt), bf16),) + stats_shapes,
        scratch_shapes=scratch,
        compiler_params=seq_params,
    )(x, w1m, g1c, b1c, mask)

    # ---- pass 2: BN1 + ReLU + conv2 + BN2 batch statistics ------------------
    y2, sc2, sf2 = pl.pallas_call(
        _make_conv_bn_kernel(C_in=Cout, C_out=Cout, Lt=Lt, Wp=Wp, NB=NB,
                             count=count, apply_bn_in=True,
                             per_tap_matmul=(Cout >= 128)),
        grid=grid_conv,
        in_specs=[img_spec(NB, Cout), rep_spec(Cout, 9 * Cout),
                  rep_spec(Cout, 1), rep_spec(Cout, 1),
                  rep_spec(Cout, 1), rep_spec(Cout, 1), rep_spec(1, Lt)],
        out_specs=(img_spec(NB, Cout),) + stats_specs,
        out_shape=(jax.ShapeDtypeStruct((N, Cout, Lt), bf16),) + stats_shapes,
        scratch_shapes=scratch,
        compiler_params=seq_params,
    )(y1, w2m, g2c, b2c, sc1, sf1, mask)

    # ---- pass 3: BN2 + ReLU (lane-dense elementwise) ------------------------
    # TODO(synk): write the ring-cropped (N, Cout, H*W) output in-kernel to
    # drop the wrapper-side slice copy.
    y3 = pl.pallas_call(
        _bn_relu_kernel,
        grid=(N,),
        in_specs=[img_spec(1, Cout), rep_spec(Cout, 1), rep_spec(Cout, 1)],
        out_specs=img_spec(1, Cout),
        out_shape=jax.ShapeDtypeStruct((N, Cout, Lt), f32),
        compiler_params=par_params,
    )(y2, sc2, sf2)

    # Drop the lane tail / padding ring and return NCHW.
    out = y3[:, :, :L].reshape(N, Cout, Hp, Wp)[:, :, 1:H + 1, 1:W + 1]
    return out


def _reference(x_nchw, w1, g1, b1, w2, g2, b2):
    """Pure-JAX reference matching PyTorch training-mode DoubleConv forward."""
    def conv(x, w):
        return jax.lax.conv_general_dilated(
            x, w, window_strides=(1, 1), padding=((1, 1), (1, 1)),
            dimension_numbers=("NCHW", "OIHW", "NCHW"))

    def bn_relu(y, g, b):
        mean = jnp.mean(y, axis=(0, 2, 3), keepdims=True)
        var = jnp.mean((y - mean) ** 2, axis=(0, 2, 3), keepdims=True)
        yn = (y - mean) * jax.lax.rsqrt(var + EPS)
        yn = yn * g.reshape(1, -1, 1, 1) + b.reshape(1, -1, 1, 1)
        return jnp.maximum(yn, 0.0)

    y = bn_relu(conv(x_nchw, w1), g1, b1)
    return bn_relu(conv(y, w2), g2, b2)


if __name__ == "__main__":
    N, Cin, Cout, H, W = 2, 4, 8, 16, 16

    key = jax.random.PRNGKey(0)
    kx, kw1, kw2 = jax.random.split(key, 3)

    x = jax.random.normal(kx, (N, Cin, H, W), dtype=jnp.float32)
    # Deterministic parameter init (shapes from nn.Conv2d / nn.BatchNorm2d).
    w1 = jax.random.normal(kw1, (Cout, Cin, 3, 3), dtype=jnp.float32) * 0.1
    w2 = jax.random.normal(kw2, (Cout, Cout, 3, 3), dtype=jnp.float32) * 0.1
    g1 = jnp.ones((Cout,), jnp.float32)   # BatchNorm default weight
    b1 = jnp.zeros((Cout,), jnp.float32)  # BatchNorm default bias
    g2 = jnp.ones((Cout,), jnp.float32)
    b2 = jnp.zeros((Cout,), jnp.float32)

    out = jax.block_until_ready(double_conv(x, w1, g1, b1, w2, g2, b2))
    ref = jax.block_until_ready(_reference(x, w1, g1, b1, w2, g2, b2))

    assert out.shape == (N, Cout, H, W)
    # Conv operands and the inter-pass activations are bf16 (f32 accumulation
    # and f32 BN statistics), so allow bf16-level tolerance vs the f32 ref.
    assert jnp.allclose(out, ref, rtol=5e-2, atol=5e-2), "mismatch vs reference"

    print("KERNEL_OK")
</pallas_src>

<mosaic_0001>
module attributes {stable_mosaic.version = 11 : i64} {
  func.func @kernel(%arg0: i32, %arg1: memref<2x8x384xbf16, #tpu.memory_space<vmem>>, %arg2: memref<8x72xbf16, #tpu.memory_space<vmem>>, %arg3: memref<8x1xf32, #tpu.memory_space<vmem>>, %arg4: memref<8x1xf32, #tpu.memory_space<vmem>>, %arg5: memref<1x384xf32, #tpu.memory_space<vmem>>, %arg6: memref<2x8x384xbf16, #tpu.memory_space<vmem>>, %arg7: memref<8x1xf32, #tpu.memory_space<vmem>>, %arg8: memref<8x1xf32, #tpu.memory_space<vmem>>, %arg9: memref<8x1xf32, #tpu.memory_space<vmem>>, %arg10: memref<8x1xf32, #tpu.memory_space<vmem>>) attributes {dimension_semantics = [#tpu.dimension_semantics<arbitrary>], iteration_bounds = array<i64: 1>, scalar_prefetch = 0 : i64, scratch_operands = 2 : i64, tpu.core_type = #tpu.core_type<tc>, window_params = [{transform_indices = @transform_0, window_bounds = array<i64: 2, 8, 384>}, {pipeline_mode = #tpu.pipeline_mode<synchronous>, transform_indices = @transform_1, window_bounds = array<i64: 8, 72>}, {pipeline_mode = #tpu.pipeline_mode<synchronous>, transform_indices = @transform_2, window_bounds = array<i64: 8, 1>}, {pipeline_mode = #tpu.pipeline_mode<synchronous>, transform_indices = @transform_3, window_bounds = array<i64: 8, 1>}, {pipeline_mode = #tpu.pipeline_mode<synchronous>, transform_indices = @transform_4, window_bounds = array<i64: 1, 384>}, {transform_indices = @transform_5, window_bounds = array<i64: 2, 8, 384>}, {pipeline_mode = #tpu.pipeline_mode<synchronous>, transform_indices = @transform_6, window_bounds = array<i64: 8, 1>}, {pipeline_mode = #tpu.pipeline_mode<synchronous>, transform_indices = @transform_7, window_bounds = array<i64: 8, 1>}]} {
    %c0_i32 = arith.constant 0 : i32
    %0 = arith.cmpi eq, %arg0, %c0_i32 : i32
    %1 = arith.extui %0 : i1 to i32
    %c0_i32_0 = arith.constant 0 : i32
    %2 = arith.cmpi ne, %1, %c0_i32_0 : i32
    scf.if %2 {
      %cst_38 = arith.constant 0.000000e+00 : f32
      %78 = vector.broadcast %cst_38 : f32 to vector<8x1xf32>
      %c0_39 = arith.constant 0 : index
      %c0_40 = arith.constant 0 : index
      %79 = vector.load %arg9[%c0_39, %c0_40] : memref<8x1xf32, #tpu.memory_space<vmem>>, vector<8x1xf32>
      tpu.vector_store %arg9[%c0_39, %c0_40], %78 {strides = array<i32>} : memref<8x1xf32, #tpu.memory_space<vmem>>, vector<8x1xf32>,
      %cst_41 = arith.constant 0.000000e+00 : f32
      %80 = vector.broadcast %cst_41 : f32 to vector<8x1xf32>
      %c0_42 = arith.constant 0 : index
      %c0_43 = arith.constant 0 : index
      %81 = vector.load %arg10[%c0_42, %c0_43] : memref<8x1xf32, #tpu.memory_space<vmem>>, vector<8x1xf32>
      tpu.vector_store %arg10[%c0_42, %c0_43], %80 {strides = array<i32>} : memref<8x1xf32, #tpu.memory_space<vmem>>, vector<8x1xf32>,
    } else {
    }
    %c0 = arith.constant 0 : index
    %c0_1 = arith.constant 0 : index
    %3 = vector.load %arg5[%c0, %c0_1] : memref<1x384xf32, #tpu.memory_space<vmem>>, vector<1x384xf32>
    %cst = arith.constant 5.000000e-01 : f32
    %4 = vector.broadcast %cst : f32 to vector<1x384xf32>
    %5 = arith.cmpf ogt, %3, %4 : vector<1x384xf32>
    %cst_2 = arith.constant 0.000000e+00 : bf16
    %6 = vector.broadcast %cst_2 : bf16 to vector<8x19xbf16>
    %cst_3 = arith.constant 0.000000e+00 : f32
    %7 = vector.broadcast %cst_3 : f32 to vector<8x1xf32>
    %cst_4 = arith.constant 0.000000e+00 : f32
    %8 = vector.broadcast %cst_4 : f32 to vector<8x1xf32>
    %c0_5 = arith.constant 0 : index
    %c0_6 = arith.constant 0 : index
    %c0_7 = arith.constant 0 : index
    %9 = vector.load %arg1[%c0_5, %c0_6, %c0_7] : memref<2x8x384xbf16, #tpu.memory_space<vmem>>, vector<1x8x384xbf16>
    %10 = vector.shape_cast %9 : vector<1x8x384xbf16> to vector<8x384xbf16>
    %11 = tpu.concatenate %6, %10, %6 in 1 : vector<8x19xbf16>, vector<8x384xbf16>, vector<8x19xbf16> -> vector<8x422xbf16>
    %12 = vector.extract_strided_slice %11 {offsets = [0, 0], sizes = [8, 384], strides = [1, 1]} : vector<8x422xbf16> to vector<8x384xbf16>
    %13 = vector.extract_strided_slice %11 {offsets = [0, 1], sizes = [8, 384], strides = [1, 1]} : vector<8x422xbf16> to vector<8x384xbf16>
    %14 = vector.extract_strided_slice %11 {offsets = [0, 2], sizes = [8, 384], strides = [1, 1]} : vector<8x422xbf16> to vector<8x384xbf16>
    %15 = vector.extract_strided_slice %11 {offsets = [0, 18], sizes = [8, 384], strides = [1, 1]} : vector<8x422xbf16> to vector<8x384xbf16>
    %16 = vector.extract_strided_slice %11 {offsets = [0, 19], sizes = [8, 384], strides = [1, 1]} : vector<8x422xbf16> to vector<8x384xbf16>
    %17 = vector.extract_strided_slice %11 {offsets = [0, 20], sizes = [8, 384], strides = [1, 1]} : vector<8x422xbf16> to vector<8x384xbf16>
    %18 = vector.extract_strided_slice %11 {offsets = [0, 36], sizes = [8, 384], strides = [1, 1]} : vector<8x422xbf16> to vector<8x384xbf16>
    %19 = vector.extract_strided_slice %11 {offsets = [0, 37], sizes = [8, 384], strides = [1, 1]} : vector<8x422xbf16> to vector<8x384xbf16>
    %20 = vector.extract_strided_slice %11 {offsets = [0, 38], sizes = [8, 384], strides = [1, 1]} : vector<8x422xbf16> to vector<8x384xbf16>
    %21 = tpu.concatenate %12, %13, %14, %15, %16, %17, %18, %19, %20 in 0 : vector<8x384xbf16>, vector<8x384xbf16>, vector<8x384xbf16>, vector<8x384xbf16>, vector<8x384xbf16>, vector<8x384xbf16>, vector<8x384xbf16>, vector<8x384xbf16>, vector<8x384xbf16> -> vector<72x384xbf16>
    %c0_8 = arith.constant 0 : index
    %c0_9 = arith.constant 0 : index
    %22 = vector.load %arg2[%c0_8, %c0_9] : memref<8x72xbf16, #tpu.memory_space<vmem>>, vector<8x72xbf16>
    %cst_10 = arith.constant dense<0.000000e+00> : vector<8x384xf32>
    %23 = tpu.matmul %22, %21, %cst_10 {dimension_numbers = #tpu.dot_dimension_numbers<[1], [0], [0], [1], [0, 0, 1, 1], [], []>} : vector<8x72xbf16>, vector<72x384xbf16>, vector<8x384xf32> -> vector<8x384xf32>
    %cst_11 = arith.constant 0.000000e+00 : f32
    %24 = vector.shape_cast %5 : vector<1x384xi1> to vector<1x384xi1>
    %25 = vector.broadcast %24 : vector<1x384xi1> to vector<8x384xi1>
    %26 = vector.broadcast %cst_11 : f32 to vector<8x384xf32>
    %27 = arith.select %25, %23, %26 : vector<8x384xi1>, vector<8x384xf32>
    %28 = arith.truncf %27 : vector<8x384xf32> to vector<8x384xbf16>
    %c0_12 = arith.constant 0 : index
    %c0_13 = arith.constant 0 : index
    %c0_14 = arith.constant 0 : index
    %29 = vector.load %arg6[%c0_12, %c0_13, %c0_14] : memref<2x8x384xbf16, #tpu.memory_space<vmem>>, vector<1x8x384xbf16>
    %30 = vector.shape_cast %29 : vector<1x8x384xbf16> to vector<8x384xbf16>
    %31 = vector.shape_cast %28 : vector<8x384xbf16> to vector<1x8x384xbf16>
    tpu.vector_store %arg6[%c0_12, %c0_13, %c0_14], %31 {strides = array<i32>} : memref<2x8x384xbf16, #tpu.memory_space<vmem>>, vector<1x8x384xbf16>,
    %cst_15 = arith.constant dense<0.000000e+00> : vector<8xf32>
    %32 = vector.multi_reduction <add>, %27, %cst_15 [1] : vector<8x384xf32> to vector<8xf32>
    %33 = vector.shape_cast %32 : vector<8xf32> to vector<8x1xf32>
    %34 = arith.addf %7, %33 : vector<8x1xf32>
    %35 = arith.mulf %27, %27 : vector<8x384xf32>
    %cst_16 = arith.constant dense<0.000000e+00> : vector<8xf32>
    %36 = vector.multi_reduction <add>, %35, %cst_16 [1] : vector<8x384xf32> to vector<8xf32>
    %37 = vector.shape_cast %36 : vector<8xf32> to vector<8x1xf32>
    %38 = arith.addf %8, %37 : vector<8x1xf32>
    %c1 = arith.constant 1 : index
    %c0_17 = arith.constant 0 : index
    %c0_18 = arith.constant 0 : index
    %39 = vector.load %arg1[%c1, %c0_17, %c0_18] : memref<2x8x384xbf16, #tpu.memory_space<vmem>>, vector<1x8x384xbf16>
    %40 = vector.shape_cast %39 : vector<1x8x384xbf16> to vector<8x384xbf16>
    %41 = tpu.concatenate %6, %40, %6 in 1 : vector<8x19xbf16>, vector<8x384xbf16>, vector<8x19xbf16> -> vector<8x422xbf16>
    %42 = vector.extract_strided_slice %41 {offsets = [0, 0], sizes = [8, 384], strides = [1, 1]} : vector<8x422xbf16> to vector<8x384xbf16>
    %43 = vector.extract_strided_slice %41 {offsets = [0, 1], sizes = [8, 384], strides = [1, 1]} : vector<8x422xbf16> to vector<8x384xbf16>
    %44 = vector.extract_strided_slice %41 {offsets = [0, 2], sizes = [8, 384], strides = [1, 1]} : vector<8x422xbf16> to vector<8x384xbf16>
    %45 = vector.extract_strided_slice %41 {offsets = [0, 18], sizes = [8, 384], strides = [1, 1]} : vector<8x422xbf16> to vector<8x384xbf16>
    %46 = vector.extract_strided_slice %41 {offsets = [0, 19], sizes = [8, 384], strides = [1, 1]} : vector<8x422xbf16> to vector<8x384xbf16>
    %47 = vector.extract_strided_slice %41 {offsets = [0, 20], sizes = [8, 384], strides = [1, 1]} : vector<8x422xbf16> to vector<8x384xbf16>
    %48 = vector.extract_strided_slice %41 {offsets = [0, 36], sizes = [8, 384], strides = [1, 1]} : vector<8x422xbf16> to vector<8x384xbf16>
    %49 = vector.extract_strided_slice %41 {offsets = [0, 37], sizes = [8, 384], strides = [1, 1]} : vector<8x422xbf16> to vector<8x384xbf16>
    %50 = vector.extract_strided_slice %41 {offsets = [0, 38], sizes = [8, 384], strides = [1, 1]} : vector<8x422xbf16> to vector<8x384xbf16>
    %51 = tpu.concatenate %42, %43, %44, %45, %46, %47, %48, %49, %50 in 0 : vector<8x384xbf16>, vector<8x384xbf16>, vector<8x384xbf16>, vector<8x384xbf16>, vector<8x384xbf16>, vector<8x384xbf16>, vector<8x384xbf16>, vector<8x384xbf16>, vector<8x384xbf16> -> vector<72x384xbf16>
    %c0_19 = arith.constant 0 : index
    %c0_20 = arith.constant 0 : index
    %52 = vector.load %arg2[%c0_19, %c0_20] : memref<8x72xbf16, #tpu.memory_space<vmem>>, vector<8x72xbf16>
    %cst_21 = arith.constant dense<0.000000e+00> : vector<8x384xf32>
    %53 = tpu.matmul %52, %51, %cst_21 {dimension_numbers = #tpu.dot_dimension_numbers<[1], [0], [0], [1], [0, 0, 1, 1], [], []>} : vector<8x72xbf16>, vector<72x384xbf16>, vector<8x384xf32> -> vector<8x384xf32>
    %cst_22 = arith.constant 0.000000e+00 : f32
    %54 = vector.shape_cast %5 : vector<1x384xi1> to vector<1x384xi1>
    %55 = vector.broadcast %54 : vector<1x384xi1> to vector<8x384xi1>
    %56 = vector.broadcast %cst_22 : f32 to vector<8x384xf32>
    %57 = arith.select %55, %53, %56 : vector<8x384xi1>, vector<8x384xf32>
    %58 = arith.truncf %57 : vector<8x384xf32> to vector<8x384xbf16>
    %c1_23 = arith.constant 1 : index
    %c0_24 = arith.constant 0 : index
    %c0_25 = arith.constant 0 : index
    %59 = vector.load %arg6[%c1_23, %c0_24, %c0_25] : memref<2x8x384xbf16, #tpu.memory_space<vmem>>, vector<1x8x384xbf16>
    %60 = vector.shape_cast %59 : vector<1x8x384xbf16> to vector<8x384xbf16>
    %61 = vector.shape_cast %58 : vector<8x384xbf16> to vector<1x8x384xbf16>
    tpu.vector_store %arg6[%c1_23, %c0_24, %c0_25], %61 {strides = array<i32>} : memref<2x8x384xbf16, #tpu.memory_space<vmem>>, vector<1x8x384xbf16>,
    %cst_26 = arith.constant dense<0.000000e+00> : vector<8xf32>
    %62 = vector.multi_reduction <add>, %57, %cst_26 [1] : vector<8x384xf32> to vector<8xf32>
    %63 = vector.shape_cast %62 : vector<8xf32> to vector<8x1xf32>
    %64 = arith.addf %34, %63 : vector<8x1xf32>
    %65 = arith.mulf %57, %57 : vector<8x384xf32>
    %cst_27 = arith.constant dense<0.000000e+00> : vector<8xf32>
    %66 = vector.multi_reduction <add>, %65, %cst_27 [1] : vector<8x384xf32> to vector<8xf32>
    %67 = vector.shape_cast %66 : vector<8xf32> to vector<8x1xf32>
    %68 = arith.addf %38, %67 : vector<8x1xf32>
    %c0_28 = arith.constant 0 : index
    %c0_29 = arith.constant 0 : index
    %69 = vector.load %arg9[%c0_28, %c0_29] : memref<8x1xf32, #tpu.memory_space<vmem>>, vector<8x1xf32>
    %70 = arith.addf %69, %64 : vector<8x1xf32>
    %c0_30 = arith.constant 0 : index
    %c0_31 = arith.constant 0 : index
    %71 = vector.load %arg9[%c0_30, %c0_31] : memref<8x1xf32, #tpu.memory_space<vmem>>, vector<8x1xf32>
    tpu.vector_store %arg9[%c0_30, %c0_31], %70 {strides = array<i32>} : memref<8x1xf32, #tpu.memory_space<vmem>>, vector<8x1xf32>,
    %c0_32 = arith.constant 0 : index
    %c0_33 = arith.constant 0 : index
    %72 = vector.load %arg10[%c0_32, %c0_33] : memref<8x1xf32, #tpu.memory_space<vmem>>, vector<8x1xf32>
    %73 = arith.addf %72, %68 : vector<8x1xf32>
    %c0_34 = arith.constant 0 : index
    %c0_35 = arith.constant 0 : index
    %74 = vector.load %arg10[%c0_34, %c0_35] : memref<8x1xf32, #tpu.memory_space<vmem>>, vector<8x1xf32>
    tpu.vector_store %arg10[%c0_34, %c0_35], %73 {strides = array<i32>} : memref<8x1xf32, #tpu.memory_space<vmem>>, vector<8x1xf32>,
    %c0_i32_36 = arith.constant 0 : i32
    %75 = arith.cmpi eq, %arg0, %c0_i32_36 : i32
    %76 = arith.extui %75 : i1 to i32
    %c0_i32_37 = arith.constant 0 : i32
    %77 = arith.cmpi ne, %76, %c0_i32_37 : i32
    scf.if %77 {
      %c0_38 = arith.constant 0 : index
      %c0_39 = arith.constant 0 : index
      %78 = vector.load %arg9[%c0_38, %c0_39] : memref<8x1xf32, #tpu.memory_space<vmem>>, vector<8x1xf32>
      %cst_40 = arith.constant 0.001953125 : f32
      %79 = vector.broadcast %cst_40 : f32 to vector<8x1xf32>
      %80 = arith.mulf %78, %79 : vector<8x1xf32>
      %c0_41 = arith.constant 0 : index
      %c0_42 = arith.constant 0 : index
      %81 = vector.load %arg10[%c0_41, %c0_42] : memref<8x1xf32, #tpu.memory_space<vmem>>, vector<8x1xf32>
      %cst_43 = arith.constant 0.001953125 : f32
      %82 = vector.broadcast %cst_43 : f32 to vector<8x1xf32>
      %83 = arith.mulf %81, %82 : vector<8x1xf32>
      %84 = arith.mulf %80, %80 : vector<8x1xf32>
      %85 = arith.subf %83, %84 : vector<8x1xf32>
      %cst_44 = arith.constant 0.000000e+00 : f32
      %86 = vector.broadcast %cst_44 : f32 to vector<8x1xf32>
      %87 = arith.maximumf %85, %86 : vector<8x1xf32>
      %cst_45 = arith.constant 9.99999974E-6 : f32
      %88 = vector.broadcast %cst_45 : f32 to vector<8x1xf32>
      %89 = arith.addf %87, %88 : vector<8x1xf32>
      %90 = math.rsqrt %89 : vector<8x1xf32>
      %c0_46 = arith.constant 0 : index
      %c0_47 = arith.constant 0 : index
      %91 = vector.load %arg3[%c0_46, %c0_47] : memref<8x1xf32, #tpu.memory_space<vmem>>, vector<8x1xf32>
      %92 = arith.mulf %91, %90 : vector<8x1xf32>
      %c0_48 = arith.constant 0 : index
      %c0_49 = arith.constant 0 : index
      %93 = vector.load %arg7[%c0_48, %c0_49] : memref<8x1xf32, #tpu.memory_space<vmem>>, vector<8x1xf32>
      tpu.vector_store %arg7[%c0_48, %c0_49], %92 {strides = array<i32>} : memref<8x1xf32, #tpu.memory_space<vmem>>, vector<8x1xf32>,
      %c0_50 = arith.constant 0 : index
      %c0_51 = arith.constant 0 : index
      %94 = vector.load %arg4[%c0_50, %c0_51] : memref<8x1xf32, #tpu.memory_space<vmem>>, vector<8x1xf32>
      %95 = arith.mulf %80, %92 : vector<8x1xf32>
      %96 = arith.subf %94, %95 : vector<8x1xf32>
      %c0_52 = arith.constant 0 : index
      %c0_53 = arith.constant 0 : index
      %97 = vector.load %arg8[%c0_52, %c0_53] : memref<8x1xf32, #tpu.memory_space<vmem>>, vector<8x1xf32>
      tpu.vector_store %arg8[%c0_52, %c0_53], %96 {strides = array<i32>} : memref<8x1xf32, #tpu.memory_space<vmem>>, vector<8x1xf32>,
    } else {
    }
    return
  }
  func.func @transform_0(%arg0: i32) -> (i32, i32, i32) {
    %c0_i32 = arith.constant 0 : i32
    %c0_i32_0 = arith.constant 0 : i32
    %c0_i32_1 = arith.constant 0 : i32
    return %arg0, %c0_i32, %c0_i32_0 : i32, i32, i32
  }
  func.func @transform_1(%arg0: i32) -> (i32, i32) {
    %c0_i32 = arith.constant 0 : i32
    %c0_i32_0 = arith.constant 0 : i32
    %c0_i32_1 = arith.constant 0 : i32
    return %c0_i32, %c0_i32_0 : i32, i32
  }
  func.func @transform_2(%arg0: i32) -> (i32, i32) {
    %c0_i32 = arith.constant 0 : i32
    %c0_i32_0 = arith.constant 0 : i32
    %c0_i32_1 = arith.constant 0 : i32
    return %c0_i32, %c0_i32_0 : i32, i32
  }
  func.func @transform_3(%arg0: i32) -> (i32, i32) {
    %c0_i32 = arith.constant 0 : i32
    %c0_i32_0 = arith.constant 0 : i32
    %c0_i32_1 = arith.constant 0 : i32
    return %c0_i32, %c0_i32_0 : i32, i32
  }
  func.func @transform_4(%arg0: i32) -> (i32, i32) {
    %c0_i32 = arith.constant 0 : i32
    %c0_i32_0 = arith.constant 0 : i32
    %c0_i32_1 = arith.constant 0 : i32
    return %c0_i32, %c0_i32_0 : i32, i32
  }
  func.func @transform_5(%arg0: i32) -> (i32, i32, i32) {
    %c0_i32 = arith.constant 0 : i32
    %c0_i32_0 = arith.constant 0 : i32
    %c0_i32_1 = arith.constant 0 : i32
    return %arg0, %c0_i32, %c0_i32_0 : i32, i32, i32
  }
  func.func @transform_6(%arg0: i32) -> (i32, i32) {
    %c0_i32 = arith.constant 0 : i32
    %c0_i32_0 = arith.constant 0 : i32
    %c0_i32_1 = arith.constant 0 : i32
    return %c0_i32, %c0_i32_0 : i32, i32
  }
  func.func @transform_7(%arg0: i32) -> (i32, i32) {
    %c0_i32 = arith.constant 0 : i32
    %c0_i32_0 = arith.constant 0 : i32
    %c0_i32_1 = arith.constant 0 : i32
    return %c0_i32, %c0_i32_0 : i32, i32
  }
}

</mosaic_0001>

<bundles_post_ra>
// kernel: tpu_custom_call.1
= control target key start
LH: loop header
LB: loop body
LE: loop exit
PB: predicated region body
PF: predicated region fallthrough
CT: control target
= control target key end

     0   :  { %13 = vsyncpa [#allocation5], 0  ;;  %s1534_s0 = inlined_call_operand.hbm [shape: bf16[2,8,384], index: 0, kind: input, shape index: {}]   ;;  %s1535_s1 = inlined_call_operand.hbm [shape: bf16[8,72], index: 1, kind: input, shape index: {}]   ;;  %s1536_s2 = inlined_call_operand.hbm [shape: f32[8,1], index: 2, kind: input, shape index: {}]   ;;  %s1537_s3 = inlined_call_operand.hbm [shape: f32[8,1], index: 3, kind: input, shape index: {}]   ;;  %s1538_s4 = inlined_call_operand.hbm [shape: f32[1,384], index: 4, kind: input, shape index: {}]   ;;  %s1539_s5 = inlined_call_operand.hbm [shape: bf16[2,8,384], index: 5, kind: output, shape index: {0}]   ;;  %s1540_s6 = inlined_call_operand.hbm [shape: f32[8,1], index: 6, kind: output, shape index: {1}]   ;;  %s1541_s7 = inlined_call_operand.hbm [shape: f32[8,1], index: 7, kind: output, shape index: {2}]  }
   0x1   :  { %14 = vsyncpa [#allocation8], 0 }
   0x2   :  { %15 = vsyncpa [#allocation11], 0 }
   0x3   :  { %16 = vsyncpa [#allocation6], 0 }
   0x4   :  { %17 = vsyncpa [#allocation15], 0  ;;  %s1050_s24 = smov [#allocation7]   ;;  %s1051_s26 = smov [#allocation10]  }
   0x5   :  { %s36_s25 = sshll.u32 %s1050_s24, 4  ;;  %s56_s27 = sshll.u32 %s1051_s26, 4  ;;  %s37_s25 = int_to_ptr.vmem [resolvable:$true] %s36_s25  ;;  %s57_s27 = int_to_ptr.vmem [resolvable:$true] %s56_s27 }
   0x6   :  { %s864_s30 = scalar_lea.hbm %s1535_s1, 64 }
   0x7   :  { %p865_p0 = scmp.ne.s32.totalorder %s1535_s1, %s864_s30  ;;  %p868_p1 = scmp.lt.u32.totalorder %s864_s30, %s1535_s1 }
   0x9   :  { %p870_p2 = pnand %p868_p1, %p865_p0 }
   0xb   :  { %873 = shalt.err (!%p870_p2)
}
   0xc   :  { %s874_s12 = scalar_lea.vmem %s37_s25, 64  ;;  %p879_p4 = scmp.lt.s32.totalorder %s37_s25, %s37_s25 }
   0xd   :  { %p875_p3 = scmp.ne.s32.totalorder %s37_s25, %s874_s12  ;;  %p880_p5 = scmp.lt.s32.totalorder %s874_s12, %s874_s12 }
   0xf   :  { %p881_p6 = por %p880_p5, %p879_p4 }
  0x11   :  { %p882_p7 = pnand %p881_p6, %p875_p3 }
  0x13   :  { %885 = shalt.err (!%p882_p7)
}
  0x14   :  { %39 = dma.hbm_to_vmem [thread:$0]  %s1535_s1, 64, %s37_s25, [#allocation8]  }
  0x15   :  { %s886_s17 = scalar_lea.hbm %s1537_s3, 128 }
  0x16   :  { %p887_p8 = scmp.ne.s32.totalorder %s1537_s3, %s886_s17  ;;  %p890_p9 = scmp.lt.u32.totalorder %s886_s17, %s1537_s3 }
  0x18   :  { %p892_p10 = pnand %p890_p9, %p887_p8 }
  0x1a   :  { %895 = shalt.err (!%p892_p10)
}
  0x1b   :  { %s896_s22 = scalar_lea.vmem %s57_s27, 128  ;;  %p901_p12 = scmp.lt.s32.totalorder %s57_s27, %s57_s27 }
  0x1c   :  { %p897_p11 = scmp.ne.s32.totalorder %s57_s27, %s896_s22  ;;  %p902_p13 = scmp.lt.s32.totalorder %s896_s22, %s896_s22 }
  0x1e   :  { %p903_p0 = por %p902_p13, %p901_p12 }
  0x20   :  { %p904_p1 = pnand %p903_p0, %p897_p11 }
  0x22   :  { %907 = shalt.err (!%p904_p1)
}
  0x23   :  { %59 = dma.hbm_to_vmem [thread:$0]  %s1537_s3, 128, %s57_s27, [#allocation11]  }
  0x24   :  { %s1052_s24 = smov [#allocation4]   ;;  %s908_s29 = scalar_lea.hbm %s1534_s0, 384 }
  0x25   :  { %s23_s25 = sshll.u32 %s1052_s24, 4  ;;  %p909_p2 = scmp.ne.s32.totalorder %s1534_s0, %s908_s29  ;;  %s24_s25 = int_to_ptr.vmem [resolvable:$true] %s23_s25 }
  0x26   :  { %p912_p3 = scmp.lt.u32.totalorder %s908_s29, %s1534_s0 }
  0x28   :  { %p914_p4 = pnand %p912_p3, %p909_p2 }
  0x2a   :  { %917 = shalt.err (!%p914_p4)
}
  0x2b   :  { %s918_s11 = scalar_lea.vmem %s24_s25, 384  ;;  %p923_p6 = scmp.lt.s32.totalorder %s24_s25, %s24_s25 }
  0x2c   :  { %p919_p5 = scmp.ne.s32.totalorder %s24_s25, %s918_s11  ;;  %p924_p7 = scmp.lt.s32.totalorder %s918_s11, %s918_s11 }
  0x2e   :  { %p925_p8 = por %p924_p7, %p923_p6 }
  0x30   :  { %p926_p9 = pnand %p925_p8, %p919_p5 }
  0x32   :  { %929 = shalt.err (!%p926_p9)
}
  0x33   :  { %s1053_s3 = smov 192   ;;  %s1054_s27 = smov 12  }
  0x34   :  { %29 = dma.hbm_to_vmem [thread:$0]  %s1534_s0, 384, %s24_s25, [#allocation5], %s1053_s3, %s1053_s3, %s1054_s27  }
  0x35   :  { %s1055_s14 = smov [#allocation9]   ;;  %s1056_s16 = smov [#allocation12]  }
  0x36   :  { %s46_s15 = sshll.u32 %s1055_s14, 4  ;;  %s66_s17 = sshll.u32 %s1056_s16, 4  ;;  %s47_s15 = int_to_ptr.vmem [resolvable:$true] %s46_s15  ;;  %s67_s17 = int_to_ptr.vmem [resolvable:$true] %s66_s17 }
  0x37   :  { %s930_s20 = scalar_lea.hbm %s1536_s2, 128 }
  0x38   :  { %p931_p10 = scmp.ne.s32.totalorder %s1536_s2, %s930_s20  ;;  %p934_p11 = scmp.lt.u32.totalorder %s930_s20, %s1536_s2 }
  0x3a   :  { %p936_p12 = pnand %p934_p11, %p931_p10 }
  0x3c   :  { %939 = shalt.err (!%p936_p12)
}
  0x3d   :  { %s940_s0 = scalar_lea.vmem %s47_s15, 128  ;;  %p945_p0 = scmp.lt.s32.totalorder %s47_s15, %s47_s15 }
  0x3e   :  { %p941_p13 = scmp.ne.s32.totalorder %s47_s15, %s940_s0  ;;  %p946_p1 = scmp.lt.s32.totalorder %s940_s0, %s940_s0 }
  0x40   :  { %p947_p2 = por %p946_p1, %p945_p0 }
  0x42   :  { %p948_p3 = pnand %p947_p2, %p941_p13 }
  0x44   :  { %951 = shalt.err (!%p948_p3)
}
  0x45   :  { %49 = dma.hbm_to_vmem [thread:$0]  %s1536_s2, 128, %s47_s15, [#allocation8]  }
  0x46   :  { %s952_s29 = scalar_lea.hbm %s1538_s4, 48 }
  0x47   :  { %p953_p4 = scmp.ne.s32.totalorder %s1538_s4, %s952_s29  ;;  %p956_p5 = scmp.lt.u32.totalorder %s952_s29, %s1538_s4 }
  0x49   :  { %p958_p6 = pnand %p956_p5, %p953_p4 }
  0x4b   :  { %961 = shalt.err (!%p958_p6)
}
  0x4c   :  { %s962_s11 = scalar_lea.vmem %s67_s17, 48  ;;  %s966_s12 = scalar_lea.vmem %s67_s17, 64 }
  0x4d   :  { %p963_p7 = scmp.ne.s32.totalorder %s67_s17, %s962_s11  ;;  %p967_p8 = scmp.lt.s32.totalorder %s67_s17, %s67_s17 }
  0x4e   :  { %p968_p9 = scmp.lt.s32.totalorder %s966_s12, %s962_s11 }
  0x50   :  { %p969_p10 = por %p968_p9, %p967_p8 }
  0x52   :  { %p970_p11 = pnand %p969_p10, %p963_p7 }
  0x54   :  { %973 = shalt.err (!%p970_p11)
}
  0x55   :  { %69 = dma.hbm_to_vmem [thread:$0]  %s1538_s4, 48, %s67_s17, [#allocation11]  }
  0x56   :  { %1040 = dma.done.wait [#allocation5], 384  }
  0x57   :  { %1041 = vsyncadd [#allocation5], 4294966912 }
  0x58   :  { %1042 = dma.done.wait [#allocation8], 192  }
  0x59   :  { %1043 = vsyncadd [#allocation8], 4294967104 }
  0x5a   :  { %1044 = dma.done.wait [#allocation11], 176  }
  0x5b   :  { %1045 = vsyncadd [#allocation11], 4294967120  ;;  %v95_v0 = vld [vmem:[#allocation4] sm:$0xff]  ;;  %v858_v1 = vld [vmem:[#allocation4 + $0x8] ss:$0 sps:$4 sm:$0xff]   ;;  %s1057_s14 = smov 19  }
  0x5c   :  { %v774_v2 = vcombine.low %v95_v0, %v95_v0  ;;  %v413_v3 = vld [vmem:[#allocation4 + $0xc] sm:$0xff]  ;;  %109 = vrot.lane.b32.xlu1 %v858_v1, %s1057_s14  ;;  %v775_v5 = vcombine.high %v95_v0, %v95_v0  ;;  %v861_v6 = vld [vmem:[#allocation4 + $0x14] ss:$0 sps:$4 sm:$0xff]   ;;  %vm111_vm0 = vcmask 154624   ;;  %s1058_s4 = smov 126   ;;  %s1059_s15 = smov 109  }
  0x5d   :  { %v782_v4 = vcombine.low %v413_v3, %v413_v3  ;;  %v783_v7 = vcombine.high %v413_v3, %v413_v3  ;;  %s1060_s16 = smov 92   ;;  %s1061_s17 = smov 90   ;;  %v1062_v19 = vmov 0.0   ;;  %vm1067_vm1 = vmmov 0  }
  0x5e   :  { %105 = vrot.lane.b32.xlu0 %v774_v2, %s1057_s14  ;;  %806 = vmatprep.subr.bf16.mxu1 %v1062_v19  ;;  %s1063_s18 = smov 127   ;;  %s1064_s19 = smov 110   ;;  %v1068_v30 = vmov 0   ;;  %vm146_vm2 = vcmask 1031168   ;;  %vm170_vm3 = vcmask 891904   ;;  %vm194_vm4 = vcmask 752640  }
  0x5f   :  { %s1065_s20 = smov 108   ;;  %s1066_s21 = smov 91   ;;  %816 = vmatprep.mubr.msk.bf16.mxu1 %vm1067_vm1, %v1062_v19  ;;  %316 = vmatprep.mubr.bf16.mxu0 %v1068_v30  ;;  %vm134_vm5 = vcmask 1039360   ;;  %vm218_vm6 = vcmask 736256   ;;  %vm222_vm7 = vcmask 1043456   ;;  %vm158_vm8 = vcmask 900096  }
  0x60   :  { %423 = vrot.lane.b32.xlu1 %v782_v4, %s1057_s14  ;;  %vm182_vm9 = vcmask 883712   ;;  %vm206_vm10 = vcmask 744448   ;;  %vm271_vm11 = vcmask 588800   ;;  %s1069_s22 = smov [#allocation13]  }
  0x61   :  { %s733_s1 = sshll.u32 %s1069_s22, 4  ;;  %s734_s1 = int_to_ptr.vmem [resolvable:$true] %s733_s1 }
  0x62   :  { %107 = vrot.lane.b32.xlu0 %v775_v5, %s1057_s14  ;;  %s974_s23 = scalar_lea.vmem %s734_s1, 384  ;;  %p979_p13 = scmp.lt.s32.totalorder %s734_s1, %s734_s1 }
  0x63   :  { %p975_p12 = scmp.ne.s32.totalorder %s734_s1, %s974_s23  ;;  %p980_p0 = scmp.lt.s32.totalorder %s974_s23, %s974_s23 }
  0x64   :  { %427 = vrot.lane.b32.xlu1 %v861_v6, %s1057_s14 }
  0x65   :  { %p981_p1 = por %p980_p0, %p979_p13 }
  0x66   :  { %425 = vrot.lane.b32.xlu0 %v783_v7, %s1057_s14 }
  0x67   :  { %p982_p2 = pnand %p981_p1, %p975_p12 }
  0xce   :  { %v110_v9 = vpop.permute.xlu1 %109 }
  0xcf   :  { %v119_v14 = vsel %vm111_vm0, %v110_v9, 0 }
  0xd0   :  { %v106_v8 = vpop.permute.xlu0 %105  ;;  %v125_v21 = vrot.slane %v119_v14, 4 }
  0xd1   :  { %v1186_v13 = vsel %vm111_vm0, 0, %v106_v8 }
  0xd2   :  { %v424_v15 = vpop.permute.xlu1 %423  ;;  %v122_v22 = vrot.slane %v1186_v13, 4 }
  0xd3   :  { %v1235_v24 = vsel %vm111_vm0, 0, %v424_v15 }
  0xd4   :  { %v108_v10 = vpop.permute.xlu0 %107  ;;  %v437_v29 = vrot.slane %v1235_v24, 4 }
  0xd5   :  { %v1176_v11 = vsel %vm111_vm0, %v106_v8, %v108_v10  ;;  %v1179_v12 = vsel %vm111_vm0, %v108_v10, %v110_v9 }
  0xd6   :  { %142 = vrot.lane.b32.xlu1 %v1179_v12, %s1058_s4  ;;  %140 = vrot.lane.b32.xlu0 %v1176_v11, %s1058_s4  ;;  %v428_v17 = vpop.permute.xlu1 %427  ;;  %v124_v20 = vrot.slane %v1179_v12, 4  ;;  %v123_v28 = vrot.slane %v1176_v11, 4 }
  0xd7   :  { %v434_v25 = vsel %vm111_vm0, %v428_v17, 0 }
  0xd8   :  { %v426_v16 = vpop.permute.xlu0 %425  ;;  %v440_v27 = vrot.slane %v434_v25, 4 }
  0xd9   :  { %v1204_v18 = vsel %vm111_vm0, %v426_v16, %v428_v17  ;;  %v1229_v23 = vsel %vm111_vm0, %v424_v15, %v426_v16  ;;  %vm90_vm0 = vcmask 7168  }
  0xda   :  { %166 = vrot.lane.b32.xlu1 %v1179_v12, %s1059_s15  ;;  %138 = vrot.lane.b32.xlu0 %v1186_v13, %s1058_s4  ;;  %v439_v26 = vrot.slane %v1204_v18, 4  ;;  %v438_v31 = vrot.slane %v1229_v23, 4  ;;  %91 = vst.msk [vmem:[#allocation2] sm:$0xff] %vm90_vm0, %v1062_v19  ;;  %92 = vst.msk [vmem:[#allocation3] sm:$0xff] %vm90_vm0, %v1062_v19 }
  0xde   :  { %190 = vrot.lane.b32.xlu1 %v1179_v12, %s1060_s16  ;;  %144 = vrot.lane.b32.xlu0 %v119_v14, %s1058_s4 }
  0xe2   :  { %212 = vrot.lane.b32.xlu1 %v1176_v11, %s1061_s17  ;;  %164 = vrot.lane.b32.xlu0 %v1176_v11, %s1059_s15 }
  0xe6   :  { %216 = vrot.lane.b32.xlu1 %v119_v14, %s1061_s17  ;;  %162 = vrot.lane.b32.xlu0 %v1186_v13, %s1059_s15 }
  0xea   :  { %168 = vrot.lane.b32.xlu0 %v119_v14, %s1059_s15  ;;  %456 = vrot.lane.b32.xlu1 %v1204_v18, %s1058_s4 }
  0xee   :  { %188 = vrot.lane.b32.xlu0 %v1176_v11, %s1060_s16  ;;  %478 = vrot.lane.b32.xlu1 %v1204_v18, %s1059_s15 }
  0xf2   :  { %186 = vrot.lane.b32.xlu0 %v1186_v13, %s1060_s16  ;;  %500 = vrot.lane.b32.xlu1 %v1204_v18, %s1060_s16 }
  0xf6   :  { %192 = vrot.lane.b32.xlu0 %v119_v14, %s1060_s16  ;;  %130 = vrot.lane.b32.xlu1 %v124_v20, %s1063_s18 }
  0xfa   :  { %210 = vrot.lane.b32.xlu0 %v1186_v13, %s1061_s17  ;;  %132 = vrot.lane.b32.xlu1 %v125_v21, %s1063_s18 }
  0xfe   :  { %214 = vrot.lane.b32.xlu0 %v1179_v12, %s1061_s17  ;;  %154 = vrot.lane.b32.xlu1 %v124_v20, %s1064_s19 }
 0x102   :  { %150 = vrot.lane.b32.xlu1 %v122_v22, %s1064_s19  ;;  %454 = vrot.lane.b32.xlu0 %v1229_v23, %s1058_s4 }
 0x106   :  { %156 = vrot.lane.b32.xlu1 %v125_v21, %s1064_s19  ;;  %452 = vrot.lane.b32.xlu0 %v1235_v24, %s1058_s4 }
 0x10a   :  { %178 = vrot.lane.b32.xlu1 %v124_v20, %s1065_s20  ;;  %458 = vrot.lane.b32.xlu0 %v434_v25, %s1058_s4 }
 0x10e   :  { %174 = vrot.lane.b32.xlu1 %v122_v22, %s1065_s20  ;;  %476 = vrot.lane.b32.xlu0 %v1229_v23, %s1059_s15 }
 0x112   :  { %180 = vrot.lane.b32.xlu1 %v125_v21, %s1065_s20  ;;  %474 = vrot.lane.b32.xlu0 %v1235_v24, %s1059_s15 }
 0x116   :  { %202 = vrot.lane.b32.xlu1 %v124_v20, %s1066_s21  ;;  %480 = vrot.lane.b32.xlu0 %v434_v25, %s1059_s15 }
 0x11a   :  { %198 = vrot.lane.b32.xlu1 %v122_v22, %s1066_s21  ;;  %498 = vrot.lane.b32.xlu0 %v1229_v23, %s1060_s16 }
 0x11e   :  { %204 = vrot.lane.b32.xlu1 %v125_v21, %s1066_s21  ;;  %496 = vrot.lane.b32.xlu0 %v1235_v24, %s1060_s16 }
 0x122   :  { %445 = vrot.lane.b32.xlu1 %v439_v26, %s1063_s18  ;;  %502 = vrot.lane.b32.xlu0 %v434_v25, %s1060_s16 }
 0x126   :  { %447 = vrot.lane.b32.xlu1 %v440_v27, %s1063_s18  ;;  %128 = vrot.lane.b32.xlu0 %v123_v28, %s1063_s18 }
 0x12a   :  { %467 = vrot.lane.b32.xlu1 %v439_v26, %s1064_s19  ;;  %126 = vrot.lane.b32.xlu0 %v122_v22, %s1063_s18 }
 0x12e   :  { %463 = vrot.lane.b32.xlu1 %v437_v29, %s1064_s19  ;;  %152 = vrot.lane.b32.xlu0 %v123_v28, %s1064_s19 }
 0x132   :  { %469 = vrot.lane.b32.xlu1 %v440_v27, %s1064_s19  ;;  %176 = vrot.lane.b32.xlu0 %v123_v28, %s1065_s20 }
 0x136   :  { %489 = vrot.lane.b32.xlu1 %v439_v26, %s1065_s20  ;;  %200 = vrot.lane.b32.xlu0 %v123_v28, %s1066_s21 }
 0x13a   :  { %485 = vrot.lane.b32.xlu1 %v437_v29, %s1065_s20  ;;  %443 = vrot.lane.b32.xlu0 %v438_v31, %s1063_s18 }
 0x13e   :  { %491 = vrot.lane.b32.xlu1 %v440_v27, %s1065_s20  ;;  %441 = vrot.lane.b32.xlu0 %v437_v29, %s1063_s18 }
 0x142   :  { %511 = vrot.lane.b32.xlu1 %v439_v26, %s1066_s21  ;;  %465 = vrot.lane.b32.xlu0 %v438_v31, %s1064_s19 }
 0x146   :  { %507 = vrot.lane.b32.xlu1 %v437_v29, %s1066_s21  ;;  %487 = vrot.lane.b32.xlu0 %v438_v31, %s1065_s20 }
 0x148   :  { %v143_v32 = vpop.permute.xlu1 %142  ;;  %v141_v33 = vpop.permute.xlu0 %140 }
 0x149   :  { %v1285_v34 = vsel %vm146_vm2, %v141_v33, %v143_v32 }
 0x14a   :  { %513 = vrot.lane.b32.xlu1 %v440_v27, %s1066_s21  ;;  %509 = vrot.lane.b32.xlu0 %v438_v31, %s1066_s21 }
 0x14c   :  { %v167_v35 = vpop.permute.xlu1 %166  ;;  %v139_v36 = vpop.permute.xlu0 %138 }
 0x14d   :  { %v1290_v37 = vsel %vm146_vm2, %v139_v36, %v141_v33 }
 0x14e   :  { %520 = vrot.lane.b32.xlu1 %v1229_v23, %s1061_s17  ;;  %518 = vrot.lane.b32.xlu0 %v1235_v24, %s1061_s17 }
 0x150   :  { %v1296_v38 = vpop.permute.xlu1 %190  ;;  %v145_v39 = vpop.permute.xlu0 %144 }
 0x151   :  { %v149_v4 = vsel %vm146_vm2, %v143_v32, %v145_v39  ;;  %v1375_v39 = vld [vmem:[#allocation7] sm:$0xf] }
 0x152   :  { %524 = vrot.lane.b32.xlu1 %v434_v25, %s1061_s17  ;;  %522 = vrot.lane.b32.xlu0 %v1204_v18, %s1061_s17 }
 0x154   :  { %v1301_v40 = vpop.permute.xlu1 %212  ;;  %v165_v41 = vpop.permute.xlu0 %164 }
 0x155   :  { %v1304_v42 = vsel %vm170_vm3, %v165_v41, %v167_v35 }
 0x158   :  { %v217_v43 = vpop.permute.xlu1 %216  ;;  %v163_v44 = vpop.permute.xlu0 %162 }
 0x159   :  { %v1307_v45 = vsel %vm170_vm3, %v163_v44, %v165_v41 }
 0x15c   :  { %v1309_v46 = vpop.permute.xlu1 %456  ;;  %v169_v47 = vpop.permute.xlu0 %168 }
 0x15d   :  { %v173_v15 = vsel %vm170_vm3, %v167_v35, %v169_v47 }
 0x160   :  { %v1311_v48 = vpop.permute.xlu1 %478  ;;  %v189_v49 = vpop.permute.xlu0 %188 }
 0x161   :  { %v1315_v50 = vsel %vm194_vm4, %v189_v49, %v1296_v38 }
 0x164   :  { %v1317_v51 = vpop.permute.xlu1 %500  ;;  %v187_v52 = vpop.permute.xlu0 %186 }
 0x165   :  { %v1320_v53 = vsel %vm194_vm4, %v187_v52, %v189_v49 }
 0x168   :  { %v131_v54 = vpop.permute.xlu1 %130  ;;  %v193_v55 = vpop.permute.xlu0 %192 }
 0x169   :  { %v197_v28 = vsel %vm194_vm4, %v1296_v38, %v193_v55 }
 0x16c   :  { %v133_v56 = vpop.permute.xlu1 %132  ;;  %v211_v57 = vpop.permute.xlu0 %210 }
 0x16d   :  { %v137_v58 = vsel %vm134_vm5, %v131_v54, %v133_v56  ;;  %v1325_v59 = vsel %vm218_vm6, %v211_v57, %v1301_v40 }
 0x16e   :  { %v232_v60 = vsel %vm222_vm7, %v1179_v12, %v137_v58 }
 0x16f   :  { %807 = vmatpush3.bf16.msra.mxu1 %v232_v60 }
 0x170   :  { %v1329_v61 = vpop.permute.xlu1 %154  ;;  %v1331_v62 = vpop.permute.xlu0 %214  ;;  %808 = vmatprep.subr.bf16.mxu1 %v1062_v19 }
 0x171   :  { %v221_v32 = vsel %vm218_vm6, %v1331_v62, %v217_v43 }
 0x172   :  { %v282_v36 = vsel %vm222_vm7, %v221_v32, 0 }
 0x174   :  { %v151_v63 = vpop.permute.xlu1 %150  ;;  %v1334_v0 = vpop.permute.xlu0 %454 }
 0x175   :  { %v1339_v1 = vsel %vm146_vm2, %v1334_v0, %v1309_v46 }
 0x178   :  { %v157_v2 = vpop.permute.xlu1 %156  ;;  %v1341_v3 = vpop.permute.xlu0 %452 }
 0x179   :  { %v161_v5 = vsel %vm158_vm8, %v1329_v61, %v157_v2 }
 0x17a   :  { %v244_v6 = vsel %vm222_vm7, %v149_v4, %v161_v5 }
 0x17b   :  { %809 = vmatpush3.bf16.msra.mxu1 %v244_v6 }
 0x17c   :  { %v1347_v7 = vpop.permute.xlu1 %178  ;;  %v459_v8 = vpop.permute.xlu0 %458  ;;  %810 = vmatprep.subr.bf16.mxu1 %v1062_v19 }
 0x180   :  { %v175_v9 = vpop.permute.xlu1 %174  ;;  %v1350_v10 = vpop.permute.xlu0 %476 }
 0x184   :  { %v181_v12 = vpop.permute.xlu1 %180  ;;  %v1352_v14 = vpop.permute.xlu0 %474 }
 0x185   :  { %v185_v16 = vsel %vm182_vm9, %v1347_v7, %v181_v12 }
 0x186   :  { %v256_v17 = vsel %vm222_vm7, %v173_v15, %v185_v16 }
 0x187   :  { %811 = vmatpush3.bf16.msra.mxu1 %v256_v17 }
 0x188   :  { %v203_v20 = vpop.permute.xlu1 %202  ;;  %v1358_v21 = vpop.permute.xlu0 %480  ;;  %812 = vmatprep.subr.bf16.mxu1 %v1062_v19 }
 0x18c   :  { %v199_v22 = vpop.permute.xlu1 %198  ;;  %v1361_v25 = vpop.permute.xlu0 %498 }
 0x190   :  { %v205_v26 = vpop.permute.xlu1 %204  ;;  %v1363_v27 = vpop.permute.xlu0 %496 }
 0x191   :  { %v209_v29 = vsel %vm206_vm10, %v203_v20, %v205_v26 }
 0x192   :  { %v268_v31 = vsel %vm222_vm7, %v197_v28, %v209_v29 }
 0x193   :  { %813 = vmatpush3.bf16.msra.mxu1 %v268_v31 }
 0x194   :  { %v446_v33 = vpop.permute.xlu1 %445  ;;  %v1371_v35 = vpop.permute.xlu0 %502  ;;  %814 = vmatprep.subr.bf16.mxu1 %v1062_v19 }
 0x197   :  { %815 = vmatpush3.bf16.msra.mxu1 %v282_v36 }
 0x198   :  { %v448_v38 = vpop.permute.xlu1 %447  ;;  %v129_v41 = vpop.permute.xlu0 %128  ;;  %820 = vmatprep.subr.bf16.mxu1 %v1062_v19 }
 0x199   :  { %v451_v44 = vsel %vm134_vm5, %v446_v33, %v448_v38  ;;  %v136_v43 = vsel %vm134_vm5, %v129_v41, %v131_v54 }
 0x19a   :  { %v228_v47 = vsel %vm222_vm7, %v1176_v11, %v136_v43  ;;  %817 = vmatmul.mubr.msk.bf16.vlgmr.msra.gmra.mrb[0].mxu1 %vm271_vm11, %v1375_v39  ;;  %v538_v49 = vsel %vm222_vm7, %v1204_v18, %v451_v44 }
 0x19b   :  { %284 = vmatprep.subr.bf16.mxu0 %v228_v47  ;;  %821 = vmatpush3.bf16.msra.mxu1 %v538_v49  ;;  %v505_v47 = vsel %vm194_vm4, %v1361_v25, %v1317_v51 }
 0x19c   :  { %v468_v52 = vpop.permute.xlu1 %467  ;;  %v127_v55 = vpop.permute.xlu0 %126  ;;  %822 = vmatprep.subr.bf16.mxu1 %v1062_v19  ;;  %830 = vmatprep.mubr.msk.bf16.mxu1 %vm1067_vm1, %v1062_v19 }
 0x19d   :  { %v135_v54 = vsel %vm134_vm5, %v127_v55, %v129_v41  ;;  %v483_v41 = vsel %vm170_vm3, %v1350_v10, %v1311_v48 }
 0x19e   :  { %v224_v11 = vsel %vm222_vm7, %v1186_v13, %v135_v54  ;;  %v462_v13 = vsel %vm146_vm2, %v1309_v46, %v459_v8 }
 0x19f   :  { %285 = vmatpush1.bf16.msra.mxu0 %v224_v11 }
 0x1a0   :  { %v464_v56 = vpop.permute.xlu1 %463  ;;  %v153_v57 = vpop.permute.xlu0 %152 }
 0x1a1   :  { %v159_v58 = vsel %vm158_vm8, %v151_v63, %v153_v57  ;;  %v160_v18 = vsel %vm158_vm8, %v153_v57, %v1329_v61 }
 0x1a2   :  { %v240_v60 = vsel %vm222_vm7, %v1285_v34, %v160_v18  ;;  %v236_v2 = vsel %vm222_vm7, %v1290_v37, %v159_v58 }
 0x1a3   :  { %286 = vmatprep.subr.bf16.mxu0 %v240_v60 }
 0x1a4   :  { %v470_v4 = vpop.permute.xlu1 %469  ;;  %287 = vmatpush1.bf16.msra.mxu0 %v236_v2  ;;  %v177_v5 = vpop.permute.xlu0 %176 }
 0x1a5   :  { %v473_v6 = vsel %vm158_vm8, %v468_v52, %v470_v4  ;;  %v183_v63 = vsel %vm182_vm9, %v175_v9, %v177_v5  ;;  %v184_v61 = vsel %vm182_vm9, %v177_v5, %v1347_v7  ;;  %v576_v5 = vld [vmem:[#allocation7] sm:$0xf] }
 0x1a6   :  { %v252_v34 = vsel %vm222_vm7, %v1304_v42, %v184_v61  ;;  %v550_v12 = vsel %vm222_vm7, %v462_v13, %v473_v6  ;;  %v248_v37 = vsel %vm222_vm7, %v1307_v45, %v183_v63  ;;  %v220_v45 = vsel %vm218_vm6, %v1301_v40, %v1331_v62  ;;  %v93_v6 = vld [vmem:[#allocation12] sm:$0x7] }
 0x1a7   :  { %288 = vmatprep.subr.bf16.mxu0 %v252_v34  ;;  %823 = vmatpush3.bf16.msra.mxu1 %v550_v12  ;;  %v484_v40 = vsel %vm170_vm3, %v1311_v48, %v1358_v21  ;;  %v460_v21 = vsel %vm146_vm2, %v1341_v3, %v1334_v0  ;;  %v482_v0 = vsel %vm170_vm3, %v1352_v14, %v1350_v10  ;;  %v366_v13 = vlaneseq }
 0x1a8   :  { %v490_v15 = vpop.permute.xlu1 %489  ;;  %289 = vmatpush1.bf16.msra.mxu0 %v248_v37  ;;  %v201_v46 = vpop.permute.xlu0 %200  ;;  %824 = vmatprep.subr.bf16.mxu1 %v1062_v19  ;;  %v504_v48 = vsel %vm194_vm4, %v1363_v27, %v1361_v25  ;;  %v506_v14 = vsel %vm194_vm4, %v1317_v51, %v1371_v35  ;;  %vm94_vm12 = vcmp.gt.f32.partialorder %v93_v6, 0.5 }
 0x1a9   :  { %v207_v8 = vsel %vm206_vm10, %v199_v22, %v201_v46  ;;  %v208_v9 = vsel %vm206_vm10, %v201_v46, %v203_v20  ;;  %v276_v20 = vsel %vm222_vm7, %v1325_v59, 0  ;;  %v367_v63 = vshrl.u32 %v366_v13, 7 }
 0x1aa   :  { %v264_v7 = vsel %vm222_vm7, %v1315_v50, %v208_v9  ;;  %v260_v42 = vsel %vm222_vm7, %v1320_v53, %v207_v8  ;;  %v365_v34 = vsel %vm94_vm12, 1, %v1068_v30 }
 0x1ab   :  { %290 = vmatprep.subr.bf16.mxu0 %v264_v7  ;;  %v376_v61 = vsub.s32 2, %v367_v63 }
 0x1ac   :  { %v486_v16 = vpop.permute.xlu1 %485  ;;  %291 = vmatpush1.bf16.msra.mxu0 %v260_v42  ;;  %v444_v17 = vpop.permute.xlu0 %443  ;;  %v368_v42 = vsub.s32 0, %v367_v63 }
 0x1ad   :  { %v450_v26 = vsel %vm134_vm5, %v444_v17, %v446_v33  ;;  %777 = vmatprep.subr.msk.bf16.mxu0 %vm222_vm7, %v220_v45  ;;  %v377_v12 = vrot.slane %v365_v34, %v376_v61  ;;  %v372_v45 = vsub.s32 1, %v367_v63 }
 0x1ae   :  { %v534_v53 = vsel %vm222_vm7, %v1229_v23, %v450_v26 }
 0x1af   :  { %vm380_vm13 = vcmp.eq.s32.totalorder %v377_v12, 1 }
 0x1b0   :  { %v492_v22 = vpop.permute.xlu1 %491  ;;  %293 = vmatpush1.bf16.msra.mxu0 %v276_v20  ;;  %v442_v50 = vpop.permute.xlu0 %441 }
 0x1b1   :  { %v495_v62 = vsel %vm182_vm9, %v490_v15, %v492_v22  ;;  %v449_v28 = vsel %vm134_vm5, %v442_v50, %v444_v17  ;;  %589 = vmatprep.subr.bf16.mxu0 %v534_v53  ;;  %v373_v17 = vrot.slane %v365_v34, %v372_v45 }
 0x1b2   :  { %v562_v29 = vsel %vm222_vm7, %v484_v40, %v495_v62  ;;  %v530_v59 = vsel %vm222_vm7, %v1235_v24, %v449_v28 }
 0x1b3   :  { %825 = vmatpush3.bf16.msra.mxu1 %v562_v29  ;;  %778 = vmatmul.mubr.msk.bf16.vlgmr.msra.gmra.mrb[0].mxu0 %vm271_vm11, %v1375_v39  ;;  %vm379_vm15 = vcmp.eq.s32.totalorder %v373_v17, 1 }
 0x1b4   :  { %v512_v31 = vpop.permute.xlu1 %511  ;;  %590 = vmatpush1.bf16.msra.mxu0 %v530_v59  ;;  %v466_v23 = vpop.permute.xlu0 %465  ;;  %826 = vmatprep.subr.bf16.mxu1 %v1062_v19 }
 0x1b5   :  { %v471_v32 = vsel %vm158_vm8, %v464_v56, %v466_v23  ;;  %v472_v33 = vsel %vm158_vm8, %v466_v23, %v468_v52  ;;  %621 = vmatprep.mubr.bf16.mxu0 %v1068_v30 }
 0x1b6   :  { %v546_v24 = vsel %vm222_vm7, %v1339_v1, %v472_v33  ;;  %v542_v36 = vsel %vm222_vm7, %v460_v21, %v471_v32 }
 0x1b7   :  { %591 = vmatprep.subr.bf16.mxu0 %v546_v24 }
 0x1b8   :  { %v508_v39 = vpop.permute.xlu1 %507  ;;  %592 = vmatpush1.bf16.msra.mxu0 %v542_v36  ;;  %v488_v38 = vpop.permute.xlu0 %487 }
 0x1b9   :  { %v493_v3 = vsel %vm182_vm9, %v486_v16, %v488_v38  ;;  %v494_v44 = vsel %vm182_vm9, %v488_v38, %v490_v15  ;;  %v369_v16 = vrot.slane %v365_v34, %v368_v42 }
 0x1ba   :  { %v558_v1 = vsel %vm222_vm7, %v483_v41, %v494_v44  ;;  %v554_v43 = vsel %vm222_vm7, %v482_v0, %v493_v3 }
 0x1bb   :  { %593 = vmatprep.subr.bf16.mxu0 %v558_v1  ;;  %vm378_vm14 = vcmp.eq.s32.totalorder %v369_v16, 1 }
 0x1bc   :  { %v514_v49 = vpop.permute.xlu1 %513  ;;  %594 = vmatpush1.bf16.msra.mxu0 %v554_v43  ;;  %v510_v10 = vpop.permute.xlu0 %509 }
 0x1bd   :  { %v517_v52 = vsel %vm206_vm10, %v512_v31, %v514_v49  ;;  %v515_v55 = vsel %vm206_vm10, %v508_v39, %v510_v10  ;;  %v516_v54 = vsel %vm206_vm10, %v510_v10, %v512_v31 }
 0x1be   :  { %v570_v11 = vsel %vm222_vm7, %v505_v47, %v516_v54  ;;  %v574_v56 = vsel %vm222_vm7, %v506_v14, %v517_v52  ;;  %v566_v57 = vsel %vm222_vm7, %v504_v48, %v515_v55 }
 0x1bf   :  { %595 = vmatprep.subr.bf16.mxu0 %v570_v11  ;;  %827 = vmatpush3.bf16.msra.mxu1 %v574_v56 }
 0x1c0   :  { %v521_v25 = vpop.permute.xlu1 %520  ;;  %596 = vmatpush1.bf16.msra.mxu0 %v566_v57  ;;  %v519_v27 = vpop.permute.xlu0 %518  ;;  %828 = vmatprep.subr.bf16.mxu1 %v1062_v19 }
 0x1c1   :  { %v526_v51 = vsel %vm218_vm6, %v519_v27, %v521_v25 }
 0x1c2   :  { %v581_v2 = vsel %vm222_vm7, %v526_v51, 0 }
 0x1c4   :  { %v525_v35 = vpop.permute.xlu1 %524  ;;  %v523_v58 = vpop.permute.xlu0 %522 }
 0x1c5   :  { %v527_v18 = vsel %vm218_vm6, %v521_v25, %v523_v58  ;;  %v528_v60 = vsel %vm218_vm6, %v523_v58, %v525_v35 }
 0x1c6   :  { %v587_v4 = vsel %vm222_vm7, %v528_v60, 0  ;;  %785 = vmatprep.subr.msk.bf16.mxu0 %vm222_vm7, %v527_v18 }
 0x1c7   :  { %598 = vmatpush1.bf16.msra.mxu0 %v581_v2  ;;  %829 = vmatpush3.bf16.msra.mxu1 %v587_v4 }
 0x1ca   :  { %786 = vmatmul.mubr.msk.bf16.vlgmr.msra.gmra.mrb[4].mxu0 %vm271_vm11, %v576_v5  ;;  %831 = vmatmul.mubr.msk.bf16.vlgmr.msra.gmra.mrb[4].mxu1 %vm271_vm11, %v576_v5 }
 0x26d   :  { %v359_v37 = vpop.f32.mrb[0].mxu1 }
 0x26e   :  { %v383_v15 = vsel %vm380_vm13, %v359_v37, 0.0  ;;  %v818_v46 = vpop.f32.mrb[1].mxu1 }
 0x26f   :  { %v791_v8 = vpack.c.bf16 %v383_v15, %v383_v15  ;;  %v362_v9 = vpop.f32.mrb[2].mxu1  ;;  %v406_v59 = vmul.f32 %v383_v15, %v383_v15 }
 0x270   :  { %v819_v7 = vpop.f32.mrb[3].mxu1 }
 0x271   :  { %398 = vst [vmem:[#allocation13 + $0x8] sm:$0xf] %v791_v8 }
 0x286   :  { %v318_v26 = vpop.f32.mrb[0].mxu0 }
 0x287   :  { %v381_v20 = vsel %vm378_vm14, %v318_v26, 0.0  ;;  %v320_v30 = vpop.f32.mrb[1].mxu0 }
 0x288   :  { %v404_v22 = vmul.f32 %v381_v20, %v381_v20  ;;  %v382_v50 = vsel %vm379_vm15, %v320_v30, 0.0  ;;  %v322_v53 = vpop.f32.mrb[2].mxu0 }
 0x289   :  { %v790_v40 = vpack.c.bf16 %v382_v50, %v381_v20  ;;  %v399_v62 = vadd.f32 %v382_v50, %v381_v20  ;;  %v405_v28 = vmul.f32 %v382_v50, %v382_v50  ;;  %v323_v29 = vpop.f32.mrb[3].mxu0 }
 0x28b   :  { %397 = vst [vmem:[#allocation13] sm:$0xff] %v790_v40  ;;  %v400_v31 = vadd.f32 %v399_v62, %v383_v15  ;;  %v407_v23 = vadd.f32 %v405_v28, %v404_v22 }
 0x28d   :  { %401 = vadd.xlane.f32.xlu0 %v400_v31  ;;  %v408_v21 = vadd.f32 %v407_v23, %v406_v59 }
 0x291   :  { %409 = vadd.xlane.f32.xlu0 %v408_v21 }
 0x29d   :  { %v623_v32 = vpop.f32.mrb[4].mxu0  ;;  %v664_v33 = vpop.f32.mrb[4].mxu1 }
 0x29e   :  { %v670_v24 = vsel %vm378_vm14, %v623_v32, 0.0  ;;  %v672_v36 = vsel %vm380_vm13, %v664_v33, 0.0  ;;  %v625_v39 = vpop.f32.mrb[5].mxu0  ;;  %v832_v38 = vpop.f32.mrb[5].mxu1 }
 0x29f   :  { %v694_v41 = vmul.f32 %v670_v24, %v670_v24  ;;  %v793_v0 = vpack.c.bf16 %v672_v36, %v672_v36  ;;  %v671_v3 = vsel %vm379_vm15, %v625_v39, 0.0  ;;  %v627_v44 = vpop.f32.mrb[6].mxu0  ;;  %v667_v1 = vpop.f32.mrb[6].mxu1  ;;  %v696_v43 = vmul.f32 %v672_v36, %v672_v36 }
 0x2a0   :  { %v792_v47 = vpack.c.bf16 %v671_v3, %v670_v24  ;;  %v689_v48 = vadd.f32 %v671_v3, %v670_v24  ;;  %v695_v49 = vmul.f32 %v671_v3, %v671_v3  ;;  %v628_v10 = vpop.f32.mrb[7].mxu0  ;;  %v833_v14 = vpop.f32.mrb[7].mxu1 }
 0x2a1   :  { %688 = vst [vmem:[#allocation13 + $0x14] sm:$0xf] %v793_v0 }
 0x2a2   :  { %687 = vst [vmem:[#allocation13 + $0xc] sm:$0xff] %v792_v47  ;;  %v690_v52 = vadd.f32 %v689_v48, %v672_v36  ;;  %v697_v55 = vadd.f32 %v695_v49, %v694_v41 }
 0x2a4   :  { %691 = vadd.xlane.f32.xlu1 %v690_v52  ;;  %v698_v54 = vadd.f32 %v697_v55, %v696_v43 }
 0x2a6   :  { %699 = vadd.xlane.f32.xlu0 %v698_v54 }
 0x2a7   :  { %985 = shalt.err (!%p982_p2)
}
 0x2a8   :  { %s986_s25 = scalar_lea.hbm %s1539_s5, 384 }
 0x2a9   :  { %p987_p3 = scmp.ne.s32.totalorder %s1539_s5, %s986_s25  ;;  %p990_p4 = scmp.lt.u32.totalorder %s986_s25, %s1539_s5 }
 0x2ab   :  { %p992_p5 = pnand %p990_p4, %p987_p3 }
 0x2ad   :  { %995 = shalt.err (!%p992_p5)
}
 0x2ae   :  { %739 = dma.vmem_to_hbm [thread:$0]  %s734_s1, 384, %s1539_s5, [#allocation6], %s1053_s3, %s1053_s3, %s1054_s27   ;;  %v702_v57 = vld [vmem:[#allocation2] sm:$0xff]  ;;  %v706_v51 = vld [vmem:[#allocation3] sm:$0xff]  ;;  %v724_v15 = vld [vmem:[#allocation10] sm:$0xff] }
 0x2af   :  { %v721_v34 = vld [vmem:[#allocation9] sm:$0xff]  ;;  %s1070_s5 = smov [#allocation14]   ;;  %s1071_s27 = smov [#allocation16]  }
 0x2b0   :  { %s746_s3 = sshll.u32 %s1070_s5, 4  ;;  %s756_s10 = sshll.u32 %s1071_s27, 4  ;;  %s747_s3 = int_to_ptr.vmem [resolvable:$true] %s746_s3  ;;  %s757_s10 = int_to_ptr.vmem [resolvable:$true] %s756_s10 }
 0x2b1   :  { %s996_s11 = scalar_lea.vmem %s747_s3, 128  ;;  %p1001_p7 = scmp.lt.s32.totalorder %s747_s3, %s747_s3 }
 0x2b2   :  { %p997_p6 = scmp.ne.s32.totalorder %s747_s3, %s996_s11  ;;  %p1002_p8 = scmp.lt.s32.totalorder %s996_s11, %s996_s11 }
 0x2b4   :  { %p1003_p9 = por %p1002_p8, %p1001_p7 }
 0x2b6   :  { %p1004_p10 = pnand %p1003_p9, %p997_p6 }
 0x31a   :  { %v402_v19 = vpop.xlane.xlu0 %401 }
 0x31e   :  { %v410_v11 = vpop.xlane.xlu0 %409 }
 0x331   :  { %v692_v56 = vpop.xlane.xlu1 %691 }
 0x332   :  { %v693_v25 = vadd.f32 %v692_v56, %v402_v19 }
 0x333   :  { %v700_v27 = vpop.xlane.xlu0 %699 }
 0x334   :  { %v703_v35 = vadd.f32 %v702_v57, %v693_v25  ;;  %v701_v58 = vadd.f32 %v700_v27, %v410_v11 }
 0x336   :  { %705 = vst.msk [vmem:[#allocation2] sm:$0xff] %vm90_vm0, %v703_v35  ;;  %v707_v18 = vadd.f32 %v706_v51, %v701_v58 }
 0x338   :  { %708 = vst.msk [vmem:[#allocation3] sm:$0xff] %vm90_vm0, %v707_v18 }
 0x33d   :  { %v712_v60 = vld [vmem:[#allocation2] sm:$0xff] }
 0x33e   :  { %v713_v2 = vmul.f32 0.001953125, %v712_v60 }
 0x33f   :  { %v714_v4 = vld [vmem:[#allocation3] sm:$0xff] }
 0x340   :  { %v715_v5 = vmul.f32 0.001953125, %v714_v4  ;;  %v716_v13 = vmul.f32 %v713_v2, %v713_v2 }
 0x342   :  { %v717_v6 = vsub.f32 %v715_v5, %v716_v13 }
 0x344   :  { %v718_v63 = vmax.f32 %v717_v6, 0.0 }
 0x346   :  { %v719_v61 = vadd.f32 1e-05, %v718_v63 }
 0x348   :  { %862 = vrsqrt.f32 %v719_v61 }
 0x352   :  { %v863_v12 = vpop.eup %862 }
 0x353   :  { %v722_v37 = vmul.f32 %v863_v12, %v721_v34 }
 0x355   :  { %723 = vst.msk [vmem:[#allocation14] sm:$0xff] %vm90_vm0, %v722_v37  ;;  %v725_v46 = vmul.f32 %v722_v37, %v713_v2 }
 0x356   :  { %1007 = shalt.err (!%p1004_p10)
}
 0x357   :  { %s1008_s13 = scalar_lea.hbm %s1540_s6, 128 }
 0x358   :  { %p1009_p11 = scmp.ne.s32.totalorder %s1540_s6, %s1008_s13  ;;  %p1012_p12 = scmp.lt.u32.totalorder %s1008_s13, %s1540_s6 }
 0x35a   :  { %p1014_p13 = pnand %p1012_p12, %p1009_p11 }
 0x35c   :  { %1017 = shalt.err (!%p1014_p13)
}
 0x35d   :  { %749 = dma.vmem_to_hbm [thread:$0]  %s747_s3, 128, %s1540_s6, [#allocation15]   ;;  %v726_v8 = vsub.f32 %v724_v15, %v725_v46 }
 0x35e   :  { %s1018_s19 = scalar_lea.vmem %s757_s10, 128  ;;  %p1023_p1 = scmp.lt.s32.totalorder %s757_s10, %s757_s10 }
 0x35f   :  { %727 = vst.msk [vmem:[#allocation16] sm:$0xff] %vm90_vm0, %v726_v8  ;;  %p1019_p0 = scmp.ne.s32.totalorder %s757_s10, %s1018_s19  ;;  %p1024_p2 = scmp.lt.s32.totalorder %s1018_s19, %s1018_s19 }
 0x361   :  { %p1025_p3 = por %p1024_p2, %p1023_p1 }
 0x363   :  { %p1026_p4 = pnand %p1025_p3, %p1019_p0 }
 0x365   :  { %1029 = shalt.err (!%p1026_p4)
}
 0x366   :  { %s1030_s22 = scalar_lea.hbm %s1541_s7, 128 }
 0x367   :  { %p1031_p5 = scmp.ne.s32.totalorder %s1541_s7, %s1030_s22  ;;  %p1034_p6 = scmp.lt.u32.totalorder %s1030_s22, %s1541_s7 }
 0x369   :  { %p1036_p7 = pnand %p1034_p6, %p1031_p5 }
 0x36b   :  { %1039 = shalt.err (!%p1036_p7)
}
 0x36c   :  { %759 = dma.vmem_to_hbm [thread:$0]  %s757_s10, 128, %s1541_s7, [#allocation15]  }
 0x36d   :  { %1046 = dma.done.wait [#allocation6], 384  }
 0x36e   :  { %1047 = vsyncadd [#allocation6], 4294966912 }
 0x36f   :  { %1048 = dma.done.wait [#allocation15], 256  }
 0x370   :  { %1049 = vsyncadd [#allocation15], 4294967040 }
 0x371   :  { %769 = vsyncpa [#allocation5], 1 }
 0x372   :  { %770 = vsyncpa [#allocation8], 1 }
 0x373   :  { %771 = vsyncpa [#allocation11], 1 }
 0x374   :  { %772 = vsyncpa [#allocation6], 1 }
 0x375   :  { %773 = vsyncpa [#allocation15], 1 }

</bundles_post_ra>
